<compile_context>
chip_gen: v7x
topology: tpu7x:2x2x1
jax: 0.10.0
libtpu: 0.0.40
codegen_flags: <defaults>
</compile_context>

<pallas_src>
import random

import jax
import jax.numpy as jnp
from jax import lax
from jax.experimental import pallas as pl
from jax.experimental.pallas import tpu as pltpu


_TARGET_BLOCK_BYTES = 2 * 1024 * 1024


def _anti_diag(n, dtype):
    """(n, n) anti-diagonal permutation matrix, built in-kernel from iotas."""
    row = lax.broadcasted_iota(jnp.int32, (n, n), 0)
    col = lax.broadcasted_iota(jnp.int32, (n, n), 1)
    return (row + col == n - 1).astype(dtype)


def _wflip_kernel(x_ref, o_ref):
    """Reverse the last (lane) axis of a (TM, W) block: out = x @ J_W."""
    w = x_ref.shape[-1]
    j = _anti_diag(w, x_ref.dtype)
    o_ref[...] = jnp.dot(
        x_ref[...], j,
        preferred_element_type=jnp.float32,
        precision=lax.Precision.HIGHEST,          # exact permutation for f32
    ).astype(o_ref.dtype)


def _hflip_kernel(x_ref, o_ref):
    """Reverse the middle (sublane) axis of a (CT, H, W) block: out[c] = J_H @ x[c]."""
    ct, h, _ = x_ref.shape
    j = _anti_diag(h, x_ref.dtype)
    for c in range(ct):                            # short static unroll (ct <= 32)
        o_ref[c] = jnp.dot(
            j, x_ref[c],
            preferred_element_type=jnp.float32,
            precision=lax.Precision.HIGHEST,
        ).astype(o_ref.dtype)


def _pick_row_tile(m, row_bytes):
    """Row-tile for the (M, W) vertical-flip view: a multiple-of-8 divisor of m
    with block size ~<= 2 MiB and >= 2 grid steps when possible; falls back to
    the full extent (always legal) if no such divisor exists."""
    cap = max(1, _TARGET_BLOCK_BYTES // max(row_bytes, 1))
    if m >= 16:
        cap = min(cap, m // 2)                     # >= 2 steps for megacore
    cap = min(cap, m)
    d = (cap // 8) * 8
    while d >= 8:
        if m % d == 0:
            return d
        d -= 8
    return m


def _pick_chan_tile(n, slice_bytes, max_unroll=32):
    """Leading-dim tile for the (N, H, W) horizontal-flip view: exact divisor of
    n, block ~<= 2 MiB, bounded unroll, >= 2 grid steps when possible."""
    ct = max(1, min(n, _TARGET_BLOCK_BYTES // max(slice_bytes, 1)))
    ct = min(ct, max_unroll)
    if n >= 2:
        ct = min(ct, max(1, n // 2))
    while n % ct:
        ct -= 1
    return ct


def bev_flip(feat, flip_type):
    """Flip a (B, C, H, W) BEV feature map along H ('horizontal') or W ('vertical')."""
    B, C, H, W = feat.shape
    if not jnp.issubdtype(feat.dtype, jnp.floating):
        # MXU has no integer path on v7x; integer feature maps are not a real
        # BEV use case, so fall back to XLA for them.
        return jnp.flip(feat, axis=-2 if flip_type == "horizontal" else -1)

    itemsize = jnp.dtype(feat.dtype).itemsize
    params = pltpu.CompilerParams(dimension_semantics=("parallel",))

    if flip_type == "vertical":                    # reverse W (lane axis)
        m = B * C * H
        x = feat.reshape(m, W)                     # free, contiguous reshape
        tm = _pick_row_tile(m, W * itemsize)
        out = pl.pallas_call(
            _wflip_kernel,
            out_shape=jax.ShapeDtypeStruct((m, W), feat.dtype),
            grid_spec=pltpu.PrefetchScalarGridSpec(
                num_scalar_prefetch=0,
                grid=(m // tm,),
                in_specs=[pl.BlockSpec((tm, W), lambda i: (i, 0))],
                out_specs=pl.BlockSpec((tm, W), lambda i: (i, 0)),
            ),
            compiler_params=params,
        )(x)
        return out.reshape(B, C, H, W)

    # horizontal: reverse H (sublane axis)
    n = B * C
    x = feat.reshape(n, H, W)                      # free, contiguous reshape
    ct = _pick_chan_tile(n, H * W * itemsize)
    out = pl.pallas_call(
        _hflip_kernel,
        out_shape=jax.ShapeDtypeStruct((n, H, W), feat.dtype),
        grid_spec=pltpu.PrefetchScalarGridSpec(
            num_scalar_prefetch=0,
            grid=(n // ct,),
            in_specs=[pl.BlockSpec((ct, H, W), lambda i: (i, 0, 0))],
            out_specs=pl.BlockSpec((ct, H, W), lambda i: (i, 0, 0)),
        ),
        compiler_params=params,
    )(x)
    return out.reshape(B, C, H, W)


class BEVRandomFlip:
    """JAX/Pallas port of the PyTorch BEVRandomFlip module (no parameters)."""

    def __init__(self, prob=0.5, training=True):
        self.prob = prob
        self.training = training

    def __call__(self, feat, gt_bboxes_3d, gt_labels_3d=None):
        prob = random.uniform(0, 1)                # host-side RNG, as in PyTorch
        if prob > self.prob or not self.training:
            return feat
        h_or_v = random.uniform(0, 1)
        flip_type = "horizontal" if h_or_v > 0.5 else "vertical"
        # TODO(synk): the PyTorch module also mutates mmdet3d box objects via
        # gt_bboxes_3d[batch].flip(flip_type) (negating x or y + yaw); that
        # custom-class side effect has no clean Pallas equivalent here.
        return bev_flip(feat, flip_type)


if __name__ == "__main__":
    key = jax.random.PRNGKey(0)
    B, C, H, W = 2, 4, 16, 16
    feat = jax.random.normal(key, (B, C, H, W), dtype=jnp.float32)

    # Exercise both flip directions and check against jnp.flip.
    out_h = jax.block_until_ready(bev_flip(feat, "horizontal"))
    out_v = jax.block_until_ready(bev_flip(feat, "vertical"))
    ref_h = jnp.flip(feat, axis=-2)
    ref_v = jnp.flip(feat, axis=-1)
    assert out_h.shape == feat.shape and out_h.dtype == feat.dtype
    assert out_v.shape == feat.shape and out_v.dtype == feat.dtype
    assert jnp.allclose(out_h, ref_h), "horizontal flip mismatch"
    assert jnp.allclose(out_v, ref_v), "vertical flip mismatch"

    # Exercise the full module path (host-side RNG decides flip / direction,
    # mirroring the PyTorch module's use of the `random` stdlib).
    random.seed(1)
    module = BEVRandomFlip(prob=0.5, training=True)
    gt_bboxes_3d = [None for _ in range(B)]        # placeholder; see TODO above
    out = jax.block_until_ready(module(feat, gt_bboxes_3d))
    assert out.shape == feat.shape
    assert (jnp.allclose(out, ref_h) or jnp.allclose(out, ref_v)
            or jnp.allclose(out, feat)), "module output mismatch"

    print("KERNEL_OK")
</pallas_src>

<mosaic_0001>
module attributes {stable_mosaic.version = 11 : i64} {
  func.func @_hflip_kernel(%arg0: i32, %arg1: memref<4x16x16xf32, #tpu.memory_space<vmem>>, %arg2: memref<4x16x16xf32, #tpu.memory_space<vmem>>) attributes {dimension_semantics = [#tpu.dimension_semantics<parallel>], iteration_bounds = array<i64: 2>, scalar_prefetch = 0 : i64, scratch_operands = 0 : i64, tpu.core_type = #tpu.core_type<tc>, window_params = [{transform_indices = @transform_0, window_bounds = array<i64: 4, 16, 16>}, {transform_indices = @transform_1, window_bounds = array<i64: 4, 16, 16>}]} {
    %0 = tpu.iota {dimensions = array<i32: 0>} : vector<16x16xi32>
    %1 = tpu.iota {dimensions = array<i32: 1>} : vector<16x16xi32>
    %2 = arith.addi %0, %1 : vector<16x16xi32>
    %c15_i32 = arith.constant 15 : i32
    %3 = vector.broadcast %c15_i32 : i32 to vector<16x16xi32>
    %4 = arith.cmpi eq, %2, %3 : vector<16x16xi32>
    %5 = arith.extui %4 : vector<16x16xi1> to vector<16x16xi32>
    %6 = arith.sitofp %5 : vector<16x16xi32> to vector<16x16xf32>
    %c0 = arith.constant 0 : index
    %c0_0 = arith.constant 0 : index
    %c0_1 = arith.constant 0 : index
    %7 = vector.load %arg1[%c0, %c0_0, %c0_1] : memref<4x16x16xf32, #tpu.memory_space<vmem>>, vector<1x16x16xf32>
    %8 = vector.shape_cast %7 : vector<1x16x16xf32> to vector<16x16xf32>
    %cst = arith.constant dense<0.000000e+00> : vector<16x16xf32>
    %9 = tpu.matmul %6, %8, %cst {dimension_numbers = #tpu.dot_dimension_numbers<[1], [0], [0], [1], [0, 0, 1, 1], [], []>, precision = #tpu.contract_precision<fp32>} : vector<16x16xf32>, vector<16x16xf32>, vector<16x16xf32> -> vector<16x16xf32>
    %c0_2 = arith.constant 0 : index
    %c0_3 = arith.constant 0 : index
    %c0_4 = arith.constant 0 : index
    %10 = vector.load %arg2[%c0_2, %c0_3, %c0_4] : memref<4x16x16xf32, #tpu.memory_space<vmem>>, vector<1x16x16xf32>
    %11 = vector.shape_cast %10 : vector<1x16x16xf32> to vector<16x16xf32>
    %12 = vector.shape_cast %9 : vector<16x16xf32> to vector<1x16x16xf32>
    tpu.vector_store %arg2[%c0_2, %c0_3, %c0_4], %12 {strides = array<i32>} : memref<4x16x16xf32, #tpu.memory_space<vmem>>, vector<1x16x16xf32>,
    %c1 = arith.constant 1 : index
    %c0_5 = arith.constant 0 : index
    %c0_6 = arith.constant 0 : index
    %13 = vector.load %arg1[%c1, %c0_5, %c0_6] : memref<4x16x16xf32, #tpu.memory_space<vmem>>, vector<1x16x16xf32>
    %14 = vector.shape_cast %13 : vector<1x16x16xf32> to vector<16x16xf32>
    %cst_7 = arith.constant dense<0.000000e+00> : vector<16x16xf32>
    %15 = tpu.matmul %6, %14, %cst_7 {dimension_numbers = #tpu.dot_dimension_numbers<[1], [0], [0], [1], [0, 0, 1, 1], [], []>, precision = #tpu.contract_precision<fp32>} : vector<16x16xf32>, vector<16x16xf32>, vector<16x16xf32> -> vector<16x16xf32>
    %c1_8 = arith.constant 1 : index
    %c0_9 = arith.constant 0 : index
    %c0_10 = arith.constant 0 : index
    %16 = vector.load %arg2[%c1_8, %c0_9, %c0_10] : memref<4x16x16xf32, #tpu.memory_space<vmem>>, vector<1x16x16xf32>
    %17 = vector.shape_cast %16 : vector<1x16x16xf32> to vector<16x16xf32>
    %18 = vector.shape_cast %15 : vector<16x16xf32> to vector<1x16x16xf32>
    tpu.vector_store %arg2[%c1_8, %c0_9, %c0_10], %18 {strides = array<i32>} : memref<4x16x16xf32, #tpu.memory_space<vmem>>, vector<1x16x16xf32>,
    %c2 = arith.constant 2 : index
    %c0_11 = arith.constant 0 : index
    %c0_12 = arith.constant 0 : index
    %19 = vector.load %arg1[%c2, %c0_11, %c0_12] : memref<4x16x16xf32, #tpu.memory_space<vmem>>, vector<1x16x16xf32>
    %20 = vector.shape_cast %19 : vector<1x16x16xf32> to vector<16x16xf32>
    %cst_13 = arith.constant dense<0.000000e+00> : vector<16x16xf32>
    %21 = tpu.matmul %6, %20, %cst_13 {dimension_numbers = #tpu.dot_dimension_numbers<[1], [0], [0], [1], [0, 0, 1, 1], [], []>, precision = #tpu.contract_precision<fp32>} : vector<16x16xf32>, vector<16x16xf32>, vector<16x16xf32> -> vector<16x16xf32>
    %c2_14 = arith.constant 2 : index
    %c0_15 = arith.constant 0 : index
    %c0_16 = arith.constant 0 : index
    %22 = vector.load %arg2[%c2_14, %c0_15, %c0_16] : memref<4x16x16xf32, #tpu.memory_space<vmem>>, vector<1x16x16xf32>
    %23 = vector.shape_cast %22 : vector<1x16x16xf32> to vector<16x16xf32>
    %24 = vector.shape_cast %21 : vector<16x16xf32> to vector<1x16x16xf32>
    tpu.vector_store %arg2[%c2_14, %c0_15, %c0_16], %24 {strides = array<i32>} : memref<4x16x16xf32, #tpu.memory_space<vmem>>, vector<1x16x16xf32>,
    %c3 = arith.constant 3 : index
    %c0_17 = arith.constant 0 : index
    %c0_18 = arith.constant 0 : index
    %25 = vector.load %arg1[%c3, %c0_17, %c0_18] : memref<4x16x16xf32, #tpu.memory_space<vmem>>, vector<1x16x16xf32>
    %26 = vector.shape_cast %25 : vector<1x16x16xf32> to vector<16x16xf32>
    %cst_19 = arith.constant dense<0.000000e+00> : vector<16x16xf32>
    %27 = tpu.matmul %6, %26, %cst_19 {dimension_numbers = #tpu.dot_dimension_numbers<[1], [0], [0], [1], [0, 0, 1, 1], [], []>, precision = #tpu.contract_precision<fp32>} : vector<16x16xf32>, vector<16x16xf32>, vector<16x16xf32> -> vector<16x16xf32>
    %c3_20 = arith.constant 3 : index
    %c0_21 = arith.constant 0 : index
    %c0_22 = arith.constant 0 : index
    %28 = vector.load %arg2[%c3_20, %c0_21, %c0_22] : memref<4x16x16xf32, #tpu.memory_space<vmem>>, vector<1x16x16xf32>
    %29 = vector.shape_cast %28 : vector<1x16x16xf32> to vector<16x16xf32>
    %30 = vector.shape_cast %27 : vector<16x16xf32> to vector<1x16x16xf32>
    tpu.vector_store %arg2[%c3_20, %c0_21, %c0_22], %30 {strides = array<i32>} : memref<4x16x16xf32, #tpu.memory_space<vmem>>, vector<1x16x16xf32>,
    return
  }
  func.func @transform_0(%arg0: i32) -> (i32, i32, i32) {
    %c0_i32 = arith.constant 0 : i32
    %c0_i32_0 = arith.constant 0 : i32
    %c0_i32_1 = arith.constant 0 : i32
    return %arg0, %c0_i32, %c0_i32_0 : i32, i32, i32
  }
  func.func @transform_1(%arg0: i32) -> (i32, i32, i32) {
    %c0_i32 = arith.constant 0 : i32
    %c0_i32_0 = arith.constant 0 : i32
    %c0_i32_1 = arith.constant 0 : i32
    return %arg0, %c0_i32, %c0_i32_0 : i32, i32, i32
  }
}

</mosaic_0001>

<bundles_post_ra>
// kernel: tpu_custom_call.1
= control target key start
LH: loop header
LB: loop body
LE: loop exit
PB: predicated region body
PF: predicated region fallthrough
CT: control target
= control target key end

     0   :  { %6 = vsyncpa [#allocation3], 0  ;;  %s3219_s0 = inlined_call_operand.hbm [shape: f32[8,16,16], index: 0, kind: input, shape index: {}]   ;;  %s3220_s1 = inlined_call_operand.hbm [shape: f32[8,16,16], index: 1, kind: output, shape index: {}]  }
   0x1   :  { %8 = vsyncpa [#allocation3 + $0x1], 0 }
   0x2   :  { %9 = vsyncpa [#allocation4], 0 }
   0x3   :  { %11 = vsyncpa [#allocation4 + $0x1], 0  ;;  %s2900_s6 = smov 0   ;;  %s2902_s7 = smov 0  }
   0x4   :  { %s2904_s8 = smov 0   ;;  %s2906_s9 = smov 0  }
   0x5 LB: > { %s2921_s10 = sadd.s32 4294967295, %s2881_s9   ;;  %s2276_s11 = sadd.s32 4294967294, %s2881_s9   ;;  %s2881_s9 = sphi %s2906_s9, %s3233_s9   ;;  %s2877_s8 = sphi %s2904_s8, %s3232_s8   ;;  %s2873_s7 = sphi %s2902_s7, %s3231_s7   ;;  %s2869_s6 = sphi %s2900_s6, %s3230_s6  }
   0x6   : > { %s2925_s12 = sadd.s32 1, %s2881_s9   ;;  %s24_s13 = sadd.s32 1, %s2877_s8 }
   0x7   : > { %s21_s14 = ssub.s32 %s2881_s9, %s2925_s12  ;;  %p31_p0 = scmp.ne.s32.totalorder %s2877_s8, %s2873_s7 }
   0x8   : > { %p22_p1 = scmp.eq.s32.totalorder %s21_s14, 0  ;;  %p32_p2 = scmp.eq.s32.totalorder %s2881_s9, 0 }
   0x9   : > { %p37_p3 = scmp.ne.s32.totalorder %s2873_s7, %s2869_s6  ;;  %p38_p4 = scmp.eq.s32.totalorder %s2921_s10, 0 }
   0xa   : > { %s2937_s15 = scalar_select %p22_p1, %s2877_s8, %s24_s13  }
   0xb   : > { %p2939_p5 = por %p32_p2, %p31_p0  ;;  %p2943_p6 = por %p38_p4, %p37_p3 }
   0xc   : > { %p61_p7 = scmp.eq.s32.totalorder %s2921_s10, 1  ;;  %p67_p8 = scmp.eq.s32.totalorder %s2276_s11, 1 }
   0xd   : > { %p2746_p10 = scmp.lt.s32.totalorder %s2881_s9, 2  ;;  %s87_s20 = sand.u32 1, %s2877_s8  }
   0xe   : > { %p2950_p11 = por %p61_p7, %p31_p0  ;;  %p2954_p12 = por %p67_p8, %p37_p3 }
   0xf   : > { %s2331_s21 = sshll.u32 %s2881_s9, 10  ;;  %s2279_s22 = sshll.u32 %s87_s20, 6 }
  0x10   : > { %s3224_s18 = scalar_select %p2950_p11, 1, 0 }
  0x11   : > { %s3225_s19 = scalar_select %p2954_p12, 1, 0 }
  0x12   : > { %s2963_s25 = scalar_lea.hbm %s3219_s0, %s2331_s21  ;;  %s91_s26 = scalar_lea.vmem [#allocation2], %s2279_s22 }
  0x13   : > { %s99_s27 = sshll.u32 %s91_s26, 4  ;;  %p2967_p13 = pnand %p2746_p10, %p2939_p5  ;;  %s2971_s27 = int_to_ptr.vmem [resolvable:$true] %s99_s27 }
  0x14   : > { %s2973_s29 = scalar_lea.sflag [#allocation3], %s87_s20  ;;  %s2785_s30 = scalar_lea.hbm %s2963_s25, 1024 }
  0x15   : > { %p2786_p0 = scmp.ne.s32.totalorder %s2963_s25, %s2785_s30  ;;  %p2787_p1 = pneg %p2967_p13 }
  0x16   : > { %s2790_s4 = scalar_lea.hbm %s3219_s0, 2048  ;;  %p2791_p4 = scmp.lt.u32.totalorder %s2963_s25, %s3219_s0 }
  0x17   : > { %p2788_p2 = pnand %p2787_p1, %p2786_p0  ;;  %p2792_p5 = scmp.lt.u32.totalorder %s2790_s4, %s2785_s30 }
  0x18   : > { %p2794_p8 = scmp.lt.u32.totalorder %s2785_s30, %s2963_s25 }
  0x19   : > { %p2789_p3 = pneg %p2788_p2  ;;  %p2793_p7 = por %p2792_p5, %p2791_p4 }
  0x1b   : > { %p2795_p10 = por %p2794_p8, %p2793_p7 }
  0x1d   : > { %p2796_p9 = pnand %p2795_p10, %p2789_p3 }
  0x1f   : > { %2799 = shalt.err (!%p2796_p9)
}
  0x20   : > { %s2800_s13 = scalar_lea.vmem %s2971_s27, 1024  ;;  %s2883_s14 = smov [#allocation2]  }
  0x21   : > { %p2801_p0 = scmp.ne.s32.totalorder %s2971_s27, %s2800_s13  ;;  %s2805_s16 = sshll.u32 %s2883_s14, 4  ;;  %s2806_s16 = int_to_ptr.vmem [resolvable:$false] %s2805_s16 }
  0x22   : > { %s2807_s20 = scalar_lea.vmem %s2806_s16, 2048  ;;  %p2808_p11 = scmp.lt.s32.totalorder %s2971_s27, %s2806_s16 }
  0x23   : > { %p2803_p2 = pnand %p2801_p0, %p2787_p1  ;;  %p2809_p4 = scmp.lt.s32.totalorder %s2807_s20, %s2800_s13 }
  0x25   : > { %p2804_p12 = pneg %p2803_p2  ;;  %p2810_p5 = por %p2809_p4, %p2808_p11 }
  0x27   : > { %p2811_p7 = pnand %p2810_p5, %p2804_p12 }
  0x29   : > { %2814 = shalt.err (!%p2811_p7)
}
  0x2a   : > { %s2884_s21 = smov 128   ;;  %s2885_s22 = smov 8  }
  0x2b   : > { %2741 = dma.hbm_to_vmem [thread:$0]  (!%p2967_p13), %s2963_s25, 1024, %s2971_s27, %s2973_s29, %s2884_s21, %s2884_s21, %s2885_s22  }
  0x2c   : > { %p2283_p9 = scmp.ge.s32.totalorder %s2881_s9, 1  ;;  %p107_p1 = scmp.lt.s32.totalorder %s2881_s9, 3 }
  0x2e   : > { %p108_p3 = pnand %p2283_p9, %p107_p1 }
  0x2f   : > { %s3004_s23 = sand.u32 (!%p108_p3), 1, %s2873_s7  }
  0x30   : > { %111 = sbr.rel (%p108_p3) target bundleno = 387 (0x183), region = 24  ;;  %s2284_s24 = sshll.u32 (!%p108_p3), %s3004_s23, 6 }
  0x31   : > { %s114_s26 = scalar_lea.sflag (!%p108_p3), [#allocation3], %s3004_s23  ;;  %s3010_s30 = scalar_lea.vmem (!%p108_p3), [#allocation2], %s2284_s24 }
  0x37   : > { %2860 = dma.done.wait (%p2943_p6), %s114_s26, 1024  }
  0x38   : > { %2862 = vsyncadd (%p2943_p6), %s114_s26, 4294966272  ;;  %v138_v0 = vlaneseq  ;;  %vm153_vm0 = vcmask 130048   ;;  %v151_v6 = vld [vmem:[%s3010_s30] sm:$0xff]  ;;  %v152_v7 = vld [vmem:[%s3010_s30 + $0x8] sm:$0xff]  ;;  %v2886_v9 = vmov 0.0   ;;  %s135_s17 = scalar_lea.vmem [#allocation5], %s2284_s24 }
  0x39   : > { %v2294_v8 = vld [vmem:[%s3010_s30 + $0x10] sm:$0xff]  ;;  %v161_v11 = vand.u32 4294901760, %v151_v6  ;;  %v164_v12 = vand.u32 4294901760, %v152_v7  ;;  %v2295_v13 = vld [vmem:[%s3010_s30 + $0x18] sm:$0xff]  ;;  %v2304_v51 = vld [vmem:[%s3010_s30 + $0x20] sm:$0xff]  ;;  %s2203_s25 = sshll.u32 %s135_s17, 4  ;;  %s3166_s25 = int_to_ptr.vmem [resolvable:$true] %s2203_s25 }
  0x3a   : > { %v139_v1 = vshrl.u32 %v138_v0, 7  ;;  %v142_v2 = vand.u32 127, %v138_v0  ;;  %v668_v14 = vand.u32 4294901760, %v2294_v8  ;;  %v671_v16 = vand.u32 4294901760, %v2295_v13  ;;  %v2305_v52 = vld [vmem:[%s3010_s30 + $0x28] sm:$0xff]  ;;  %v2314_v53 = vld [vmem:[%s3010_s30 + $0x30] sm:$0xff] }
  0x3b   : > { %v3026_v18 = vpack.c.bf16 %v164_v12, %v161_v11  ;;  %v249_v20 = vsub.f32 %v151_v6, %v161_v11  ;;  %v256_v21 = vsub.f32 %v152_v7, %v164_v12  ;;  %v2315_v54 = vld [vmem:[%s3010_s30 + $0x38] sm:$0xff]  ;;  %v1176_v55 = vand.u32 4294901760, %v2304_v51  ;;  %s2333_s27 = sshll.u32 %s2921_s10, 10  ;;  %s2189_s10 = scalar_lea.sflag [#allocation4], %s3004_s23 }
  0x3c   : > { %v143_v3 = vadd.s32 %v142_v2, %v139_v1  ;;  %v140_v4 = vadd.s32 8, %v139_v1  ;;  %v3030_v22 = vpack.c.bf16 %v671_v16, %v668_v14  ;;  %v756_v25 = vsub.f32 %v2294_v8, %v668_v14  ;;  %s3171_s2 = scalar_lea.hbm %s3220_s1, %s2333_s27  ;;  %s2815_s3 = scalar_lea.vmem %s3166_s25, 1024 }
  0x3d   : > { %2599 = vmatprep.subr.bf16.mxu0 %v3026_v18  ;;  %v250_v27 = vand.u32 4294901760, %v249_v20  ;;  %v257_v28 = vand.u32 4294901760, %v256_v21  ;;  %v763_v29 = vsub.f32 %v2295_v13, %v671_v16  ;;  %v2606_v47 = vpack.c.bf16 %v256_v21, %v249_v20  ;;  %p2816_p6 = scmp.ne.s32.totalorder %s3166_s25, %s2815_s3  ;;  %p3227_p11 = scmp.ne.s32.totalorder %s3224_s18, 0 }
  0x3e   : > { %vm145_vm1 = vcmp.eq.s32.totalorder %v143_v3, 15  ;;  %v144_v5 = vadd.s32 %v142_v2, %v140_v4  ;;  %2623 = vmatprep.subr.bf16.mxu1 %v3030_v22  ;;  %2601 = vmatpush3.bf16.msra.mxu0 %v3026_v18  ;;  %v757_v31 = vand.u32 4294901760, %v756_v25  ;;  %v1179_v56 = vand.u32 4294901760, %v2305_v52  ;;  %s2887_s4 = smov [#allocation5]  }
  0x3f   : > { %v3019_v10 = vsel %vm145_vm1, 1.0, %v2886_v9  ;;  %2625 = vmatpush3.bf16.msra.mxu1 %v3030_v22  ;;  %v251_v33 = vsub.f32 %v249_v20, %v250_v27  ;;  %v258_v34 = vsub.f32 %v256_v21, %v257_v28  ;;  %v764_v35 = vand.u32 4294901760, %v763_v29  ;;  %p2817_p12 = pnand %p2816_p6, %p3227_p11  ;;  %s2819_s5 = sshll.u32 %s2887_s4, 4  ;;  %s2820_s5 = int_to_ptr.vmem [resolvable:$false] %s2819_s5 }
  0x40   : > { %v155_v15 = vsel %vm153_vm0, %v3019_v10, 0  ;;  %vm146_vm2 = vcmp.eq.s32.totalorder %v144_v5, 15  ;;  %v758_v37 = vsub.f32 %v756_v25, %v757_v31  ;;  %v2630_v48 = vpack.c.bf16 %v763_v29, %v756_v25  ;;  %s2821_s11 = scalar_lea.vmem %s2820_s5, 2048  ;;  %p2822_p8 = scmp.lt.s32.totalorder %s3166_s25, %s2820_s5 }
  0x41   : > { %v3024_v17 = vsub.f32 %v155_v15, %v155_v15  ;;  %v3028_v19 = vsel %vm146_vm2, 1.0, %v2886_v9  ;;  %v252_v39 = vand.u32 4294901760, %v251_v33  ;;  %v259_v40 = vand.u32 4294901760, %v258_v34  ;;  %p2818_p13 = pneg %p2817_p12  ;;  %p2823_p10 = scmp.lt.s32.totalorder %s2821_s11, %s2815_s3 }
  0x42   : > { %v158_v24 = vsel %vm153_vm0, %v3028_v19, 0  ;;  %v765_v41 = vsub.f32 %v763_v29, %v764_v35  ;;  %v759_v42 = vand.u32 4294901760, %v758_v37  ;;  %v2614_v49 = vpack.c.bf16 %v257_v28, %v250_v27 }
  0x43   : > { %v3033_v23 = vand.u32 4294901760, %v3024_v17  ;;  %v3038_v26 = vsub.f32 %v158_v24, %v158_v24  ;;  %v2602_v44 = vpack.c.bf16 %v259_v40, %v252_v39  ;;  %v2638_v50 = vpack.c.bf16 %v764_v35, %v757_v31  ;;  %p2824_p0 = por %p2823_p10, %p2822_p8 }
  0x44   : > { %v766_v45 = vand.u32 4294901760, %v765_v41  ;;  %v1684_v57 = vand.u32 4294901760, %v2314_v53  ;;  %v1687_v58 = vand.u32 4294901760, %v2315_v54  ;;  %v3080_v59 = vsub.f32 %v2304_v51, %v1176_v55 }
  0x45   : > { %v230_v30 = vsub.f32 %v3024_v17, %v3033_v23  ;;  %v3046_v32 = vand.u32 4294901760, %v3038_v26  ;;  %2603 = vmatprep.subr.bf16.mxu0 %v2602_v44  ;;  %v1271_v60 = vsub.f32 %v2305_v52, %v1179_v56  ;;  %v3091_v3 = vpack.c.bf16 %v1179_v56, %v1176_v55  ;;  %p2825_p2 = pnand %p2824_p0, %p2818_p13 }
  0x46   : > { %v2626_v46 = vpack.c.bf16 %v766_v45, %v759_v42  ;;  %v1772_v61 = vsub.f32 %v2314_v53, %v1684_v57  ;;  %v1779_v62 = vsub.f32 %v2315_v54, %v1687_v58  ;;  %v1265_v63 = vand.u32 4294901760, %v3080_v59 }
  0x47   : > { %v3048_v36 = vand.u32 4294901760, %v230_v30  ;;  %v240_v38 = vsub.f32 %v3038_v26, %v3046_v32  ;;  %v1272_v0 = vand.u32 4294901760, %v1271_v60  ;;  %v3093_v4 = vpack.c.bf16 %v1687_v58, %v1684_v57 }
  0x48   : > { %2627 = vmatprep.subr.bf16.mxu1 %v2626_v46  ;;  %v1773_v1 = vand.u32 4294901760, %v1772_v61  ;;  %v1780_v2 = vand.u32 4294901760, %v1779_v62  ;;  %v1266_v5 = vsub.f32 %v3080_v59, %v1265_v63  ;;  %v2654_v16 = vpack.c.bf16 %v1271_v60, %v3080_v59 }
  0x49   : > { %2434 = vmatprep.mubr.f32.mxu0 %v3048_v36  ;;  %2476 = vmatprep.mubr.f32.mxu1 %v3048_v36  ;;  %v3054_v43 = vand.u32 4294901760, %v240_v38  ;;  %v1273_v6 = vsub.f32 %v1271_v60, %v1272_v0  ;;  %v2662_v20 = vpack.c.bf16 %v1272_v0, %v1265_v63 }
  0x4a   : > { %v1774_v7 = vsub.f32 %v1772_v61, %v1773_v1  ;;  %v1781_v8 = vsub.f32 %v1779_v62, %v1780_v2  ;;  %v1267_v9 = vand.u32 4294901760, %v1266_v5  ;;  %v2686_v21 = vpack.c.bf16 %v1780_v2, %v1773_v1 }
  0x4b   : > { %2435 = vmatmul.mubr.f32.vlgmr.msra.gmra.mrb[0].mxu0 %v3054_v43  ;;  %2477 = vmatmul.mubr.f32.vlgmr.msra.gmra.mrb[0].mxu1 %v3054_v43  ;;  %v1274_v11 = vand.u32 4294901760, %v1273_v6 }
  0x4c   : > { %2441 = vmatprep.mubr.msk.f32.mxu0 %vm153_vm0, %v3019_v10  ;;  %2605 = vmatpush3.bf16.msra.mxu0 %v2602_v44  ;;  %v1775_v12 = vand.u32 4294901760, %v1774_v7  ;;  %v1782_v13 = vand.u32 4294901760, %v1781_v8 }
  0x4d   : > { %2629 = vmatpush3.bf16.msra.mxu1 %v2626_v46  ;;  %2483 = vmatprep.mubr.msk.f32.mxu1 %vm153_vm0, %v3019_v10  ;;  %v2650_v14 = vpack.c.bf16 %v1274_v11, %v1267_v9 }
  0x4e   : > { %2607 = vmatprep.subr.bf16.mxu0 %v2606_v47  ;;  %2631 = vmatprep.subr.bf16.mxu1 %v2630_v48  ;;  %v2674_v15 = vpack.c.bf16 %v1782_v13, %v1775_v12 }
  0x53   : > { %2442 = vmatmul.mubr.msk.f32.vlgmr.msra.gmra.mrb[0].mxu0 %vm153_vm0, %v3028_v19  ;;  %2484 = vmatmul.mubr.msk.f32.vlgmr.msra.gmra.mrb[0].mxu1 %vm153_vm0, %v3028_v19 }
  0x54   : > { %2609 = vmatpush3.bf16.msra.mxu0 %v2606_v47  ;;  %2633 = vmatpush3.bf16.msra.mxu1 %v2630_v48 }
  0x55   : > { %2448 = vmatprep.mubr.f32.mxu0 %v3024_v17  ;;  %2490 = vmatprep.mubr.f32.mxu1 %v3024_v17 }
  0x56   : > { %2611 = vmatprep.subr.bf16.mxu0 %v3026_v18  ;;  %2635 = vmatprep.subr.bf16.mxu1 %v3030_v22 }
  0x5b   : > { %2449 = vmatmul.mubr.f32.vlgmr.msra.gmra.mrb[0].mxu0 %v3038_v26  ;;  %2491 = vmatmul.mubr.f32.vlgmr.msra.gmra.mrb[0].mxu1 %v3038_v26 }
  0x5c   : > { %2613 = vmatpush3.bf16.msra.mxu0 %v3026_v18  ;;  %2637 = vmatpush3.bf16.msra.mxu1 %v3030_v22 }
  0x5d   : > { %2455 = vmatprep.mubr.f32.mxu0 %v3033_v23  ;;  %2497 = vmatprep.mubr.f32.mxu1 %v3033_v23 }
  0x5e   : > { %2615 = vmatprep.subr.bf16.mxu0 %v2614_v49  ;;  %2639 = vmatprep.subr.bf16.mxu1 %v2638_v50 }
  0x63   : > { %2456 = vmatmul.mubr.f32.vlgmr.msra.gmra.mrb[0].mxu0 %v3046_v32  ;;  %2498 = vmatmul.mubr.f32.vlgmr.msra.gmra.mrb[0].mxu1 %v3046_v32 }
  0x64   : > { %2617 = vmatpush3.bf16.msra.mxu0 %v2614_v49  ;;  %2641 = vmatpush3.bf16.msra.mxu1 %v2638_v50 }
  0x65   : > { %2462 = vmatprep.mubr.msk.f32.mxu0 %vm153_vm0, %v3019_v10  ;;  %2504 = vmatprep.mubr.msk.f32.mxu1 %vm153_vm0, %v3019_v10 }
  0x66   : > { %2619 = vmatprep.subr.bf16.mxu0 %v3026_v18  ;;  %2643 = vmatprep.subr.bf16.mxu1 %v3030_v22 }
  0x6b   : > { %2463 = vmatmul.mubr.msk.f32.vlgmr.msra.gmra.mrb[0].mxu0 %vm153_vm0, %v3028_v19  ;;  %2505 = vmatmul.mubr.msk.f32.vlgmr.msra.gmra.mrb[0].mxu1 %vm153_vm0, %v3028_v19 }
  0x6c   : > { %2621 = vmatpush3.bf16.msra.mxu0 %v3026_v18  ;;  %2645 = vmatpush3.bf16.msra.mxu1 %v3030_v22  ;;  %v2678_v18 = vpack.c.bf16 %v1779_v62, %v1772_v61 }
  0x6d   : > { %2469 = vmatprep.mubr.msk.f32.mxu0 %vm153_vm0, %v3019_v10  ;;  %2511 = vmatprep.mubr.msk.f32.mxu1 %vm153_vm0, %v3019_v10 }
  0x6e   : > { %2647 = vmatprep.subr.bf16.mxu0 %v3091_v3  ;;  %2671 = vmatprep.subr.bf16.mxu1 %v3093_v4 }
  0x73   : > { %2470 = vmatmul.mubr.msk.f32.vlgmr.msra.gmra.mrb[0].mxu0 %vm153_vm0, %v3028_v19  ;;  %2512 = vmatmul.mubr.msk.f32.vlgmr.msra.gmra.mrb[0].mxu1 %vm153_vm0, %v3028_v19 }
  0x74   : > { %2649 = vmatpush3.bf16.msra.mxu0 %v3091_v3  ;;  %2673 = vmatpush3.bf16.msra.mxu1 %v3093_v4 }
  0x75   : > { %2518 = vmatprep.mubr.f32.mxu0 %v3048_v36  ;;  %2560 = vmatprep.mubr.f32.mxu1 %v3048_v36 }
  0x76   : > { %2651 = vmatprep.subr.bf16.mxu0 %v2650_v14  ;;  %2675 = vmatprep.subr.bf16.mxu1 %v2674_v15 }
  0x77   : > { %2519 = vmatmul.mubr.f32.vlgmr.msra.gmra.mrb[2].mxu0 %v3054_v43  ;;  %2561 = vmatmul.mubr.f32.vlgmr.msra.gmra.mrb[2].mxu1 %v3054_v43 }
  0x78   : > { %2653 = vmatpush3.bf16.msra.mxu0 %v2650_v14  ;;  %2677 = vmatpush3.bf16.msra.mxu1 %v2674_v15 }
  0x79   : > { %2525 = vmatprep.mubr.msk.f32.mxu0 %vm153_vm0, %v3019_v10  ;;  %2567 = vmatprep.mubr.msk.f32.mxu1 %vm153_vm0, %v3019_v10 }
  0x7a   : > { %2655 = vmatprep.subr.bf16.mxu0 %v2654_v16  ;;  %2679 = vmatprep.subr.bf16.mxu1 %v2678_v18 }
  0x7f   : > { %2526 = vmatmul.mubr.msk.f32.vlgmr.msra.gmra.mrb[2].mxu0 %vm153_vm0, %v3028_v19  ;;  %2568 = vmatmul.mubr.msk.f32.vlgmr.msra.gmra.mrb[2].mxu1 %vm153_vm0, %v3028_v19 }
  0x80   : > { %2657 = vmatpush3.bf16.msra.mxu0 %v2654_v16  ;;  %2681 = vmatpush3.bf16.msra.mxu1 %v2678_v18 }
  0x81   : > { %2532 = vmatprep.mubr.f32.mxu0 %v3024_v17  ;;  %2574 = vmatprep.mubr.f32.mxu1 %v3024_v17 }
  0x82   : > { %2659 = vmatprep.subr.bf16.mxu0 %v3091_v3  ;;  %2683 = vmatprep.subr.bf16.mxu1 %v3093_v4 }
  0x87   : > { %2533 = vmatmul.mubr.f32.vlgmr.msra.gmra.mrb[2].mxu0 %v3038_v26  ;;  %2575 = vmatmul.mubr.f32.vlgmr.msra.gmra.mrb[2].mxu1 %v3038_v26 }
  0x88   : > { %2661 = vmatpush3.bf16.msra.mxu0 %v3091_v3  ;;  %2685 = vmatpush3.bf16.msra.mxu1 %v3093_v4 }
  0x89   : > { %2539 = vmatprep.mubr.f32.mxu0 %v3033_v23  ;;  %2581 = vmatprep.mubr.f32.mxu1 %v3033_v23 }
  0x8a   : > { %2663 = vmatprep.subr.bf16.mxu0 %v2662_v20  ;;  %2687 = vmatprep.subr.bf16.mxu1 %v2686_v21 }
  0x8f   : > { %2540 = vmatmul.mubr.f32.vlgmr.msra.gmra.mrb[2].mxu0 %v3046_v32  ;;  %2582 = vmatmul.mubr.f32.vlgmr.msra.gmra.mrb[2].mxu1 %v3046_v32 }
  0x90   : > { %2665 = vmatpush3.bf16.msra.mxu0 %v2662_v20  ;;  %2689 = vmatpush3.bf16.msra.mxu1 %v2686_v21 }
  0x91   : > { %2546 = vmatprep.mubr.msk.f32.mxu0 %vm153_vm0, %v3019_v10  ;;  %2588 = vmatprep.mubr.msk.f32.mxu1 %vm153_vm0, %v3019_v10 }
  0x92   : > { %2667 = vmatprep.subr.bf16.mxu0 %v3091_v3  ;;  %2691 = vmatprep.subr.bf16.mxu1 %v3093_v4 }
  0x97   : > { %2547 = vmatmul.mubr.msk.f32.vlgmr.msra.gmra.mrb[2].mxu0 %vm153_vm0, %v3028_v19  ;;  %2589 = vmatmul.mubr.msk.f32.vlgmr.msra.gmra.mrb[2].mxu1 %vm153_vm0, %v3028_v19 }
  0x98   : > { %2669 = vmatpush3.bf16.msra.mxu0 %v3091_v3  ;;  %2693 = vmatpush3.bf16.msra.mxu1 %v3093_v4 }
  0x99   : > { %2553 = vmatprep.mubr.msk.f32.mxu0 %vm153_vm0, %v3019_v10  ;;  %2595 = vmatprep.mubr.msk.f32.mxu1 %vm153_vm0, %v3019_v10 }
  0x9f   : > { %2554 = vmatmul.mubr.msk.f32.vlgmr.msra.gmra.mrb[2].mxu0 %vm153_vm0, %v3028_v19  ;;  %2596 = vmatmul.mubr.msk.f32.vlgmr.msra.gmra.mrb[2].mxu1 %vm153_vm0, %v3028_v19 }
 0x146   : > { %v2471_v17 = vpop.f32.mrb[0].mxu0  ;;  %v2513_v22 = vpop.f32.mrb[0].mxu1 }
 0x147   : > { %663 = vst.msk [vmem:[%s135_s17 + $0x8] sm:$0xff] %vm153_vm0, %v2471_v17  ;;  %2303 = vst.msk [vmem:[%s135_s17 + $0x18] sm:$0xff] %vm153_vm0, %v2513_v22  ;;  %v652_v23 = vpop.f32.mrb[1].mxu0  ;;  %v1159_v24 = vpop.f32.mrb[1].mxu1 }
 0x148   : > { %662 = vst.msk [vmem:[%s135_s17] sm:$0xff] %vm153_vm0, %v652_v23  ;;  %2302 = vst.msk [vmem:[%s135_s17 + $0x10] sm:$0xff] %vm153_vm0, %v1159_v24 }
 0x172   : > { %v2555_v10 = vpop.f32.mrb[2].mxu0  ;;  %v2597_v19 = vpop.f32.mrb[2].mxu1 }
 0x173   : > { %2313 = vst.msk [vmem:[%s135_s17 + $0x28] sm:$0xff] %vm153_vm0, %v2555_v10  ;;  %2323 = vst.msk [vmem:[%s135_s17 + $0x38] sm:$0xff] %vm153_vm0, %v2597_v19  ;;  %v1667_v25 = vpop.f32.mrb[3].mxu0  ;;  %v2175_v26 = vpop.f32.mrb[3].mxu1 }
 0x174   : > { %2312 = vst.msk [vmem:[%s135_s17 + $0x20] sm:$0xff] %vm153_vm0, %v1667_v25  ;;  %2322 = vst.msk [vmem:[%s135_s17 + $0x30] sm:$0xff] %vm153_vm0, %v2175_v26 }
 0x175   : > { %2828 = shalt.err (!%p2825_p2)
}
 0x176   : > { %s2829_s13 = scalar_lea.hbm %s3171_s2, 1024  ;;  %s2833_s20 = scalar_lea.hbm %s3220_s1, 2048 }
 0x177   : > { %p2830_p4 = scmp.ne.s32.totalorder %s3171_s2, %s2829_s13  ;;  %p2834_p9 = scmp.lt.u32.totalorder %s3171_s2, %s3220_s1 }
 0x178   : > { %p2835_p1 = scmp.lt.u32.totalorder %s2833_s20, %s2829_s13  ;;  %p2837_p6 = scmp.lt.u32.totalorder %s2829_s13, %s3171_s2 }
 0x179   : > { %p2831_p5 = pnand %p2830_p4, %p3227_p11 }
 0x17a   : > { %p2836_p3 = por %p2835_p1, %p2834_p9 }
 0x17b   : > { %p2832_p7 = pneg %p2831_p5 }
 0x17c   : > { %p2838_p12 = por %p2837_p6, %p2836_p3 }
 0x17e   : > { %p2839_p13 = pnand %p2838_p12, %p2832_p7 }
 0x180   : > { %2842 = shalt.err (!%p2839_p13)
}
 0x181   : > { %s2888_s24 = smov 128   ;;  %s2889_s26 = smov 8  }
 0x182   : > { %2736 = dma.vmem_to_hbm [thread:$0]  (%p3227_p11), %s3166_s25, 1024, %s3171_s2, %s2189_s10, %s2888_s24, %s2888_s24, %s2889_s26  }
 0x183 PF: > { %s2218_s30 = sand.u32 1, %s2869_s6   ;;  %p3228_p8 = scmp.ne.s32.totalorder %s3225_s19, 0 }
 0x184   : > { %p3229_p10 = scmp.ge.s32.totalorder %s2881_s9, 2  ;;  %s2219_s17 = scalar_lea.sflag [#allocation4], %s2218_s30 }
 0x186   : > { %p2743_p0 = pnand %p3229_p10, %p3228_p8 }
 0x188   : > { %2864 = dma.done.wait (!%p2743_p0), %s2219_s17, 1024  }
 0x189   : > { %2866 = vsyncadd (!%p2743_p0), %s2219_s17, 4294966272  ;;  %p14_p2 = scmp.ge.s32.totalorder %s2925_s12, 4   ;;  %s3230_s6 = smov %s2873_s7 }
 0x18a   : > { %s3231_s7 = smov %s2877_s8  ;;  %s3232_s8 = smov %s2937_s15 }
 0x18b   : > { %s3233_s9 = smov %s2925_s12  ;;  %16 = sbr.rel (!%p14_p2) target bundleno = 5 (0x5), region = 75 }
 0x192   :  { %2224 = vsyncpa [#allocation3], 1 }
 0x193   :  { %2226 = vsyncpa [#allocation3 + $0x1], 1 }
 0x194   :  { %2227 = vsyncpa [#allocation4], 1 }
 0x195   :  { %2229 = vsyncpa [#allocation4 + $0x1], 1 }

</bundles_post_ra>
